<compile_context>
chip_gen: v7x
topology: tpu7x:2x2x1
jax: 0.10.0
libtpu: 0.0.40
codegen_flags: <defaults>
</compile_context>

<pallas_src>
import functools

import jax
import jax.numpy as jnp
from jax import lax
from jax.experimental import pallas as pl
from jax.experimental.pallas import tpu as pltpu

_LANE = 128
_SUBLANE = 8
_NEG_INF = -1e30


def _round_up(x, m):
    return ((x + m - 1) // m) * m


def _actor_critic_kernel(state_ref, w1_ref, b1_ref, w2_ref, b2_ref,
                         wh_ref, bh_ref, out_ref, xin_ref, *, action_size):
    tb, in_cols = state_ref.shape
    ap = xin_ref.shape[1]

    # Lane-pad the streamed activation tile in VMEM (the HBM input stays at its
    # natural, unpadded feature width).
    if in_cols == ap:
        x = state_ref[...].astype(jnp.bfloat16)
    else:
        xin_ref[:, :in_cols] = state_ref[...]
        xin_ref[:, in_cols:] = jnp.zeros((tb, ap - in_cols), xin_ref.dtype)
        x = xin_ref[...].astype(jnp.bfloat16)                        # [TB, AP]

    # fc1 + ReLU  (bf16 operands, f32 accumulation)
    h1 = jnp.dot(x, w1_ref[...], preferred_element_type=jnp.float32) + b1_ref[...]
    h1 = jnp.maximum(h1, 0.0).astype(jnp.bfloat16)                   # [TB, HP]

    # fc2 + ReLU
    h2 = jnp.dot(h1, w2_ref[...], preferred_element_type=jnp.float32) + b2_ref[...]
    h2 = jnp.maximum(h2, 0.0).astype(jnp.bfloat16)                   # [TB, HP]

    # Fused actor+critic head: cols [0, A) = actor logits, col A = critic value,
    # cols > A are zero (padded weight/bias columns are exactly zero).
    raw = jnp.dot(h2, wh_ref[...], preferred_element_type=jnp.float32) + bh_ref[...]

    col = lax.broadcasted_iota(jnp.int32, raw.shape, 1)              # [TB, OP]
    actor_mask = col < action_size

    # Masked, max-subtracted softmax over the actor columns only (kept in f32).
    logits = jnp.where(actor_mask, raw, _NEG_INF)
    m = jnp.max(logits, axis=-1, keepdims=True)
    e = jnp.exp(logits - m)
    inv = pl.reciprocal(jnp.sum(e, axis=-1, keepdims=True), approx=True)
    probs = e * inv

    # Single lane-dense output slab: probs | value | zeros.
    out_ref[...] = jnp.where(actor_mask, probs, raw).astype(out_ref.dtype)


def init_params(key, hidden_size, action_size):
    """nn.Linear-style init (uniform +-1/sqrt(fan_in)); weights are [in, out]."""
    def linear(k, fan_in, fan_out):
        kw, kb = jax.random.split(k)
        bound = 1.0 / jnp.sqrt(fan_in)
        w = jax.random.uniform(kw, (fan_in, fan_out), jnp.float32, -bound, bound)
        b = jax.random.uniform(kb, (1, fan_out), jnp.float32, -bound, bound)
        return w, b

    k1, k2, k3, k4 = jax.random.split(key, 4)
    w1, b1 = linear(k1, action_size, hidden_size)   # fc1
    w2, b2 = linear(k2, hidden_size, hidden_size)   # fc2
    wa, ba = linear(k3, hidden_size, action_size)   # actor
    wc, bc = linear(k4, hidden_size, 1)             # critic
    return (w1, b1, w2, b2, wa, ba, wc, bc)


def prepare_params(params, hidden_size, action_size):
    """Fuse actor+critic heads, zero-pad feature dims, cast weights to bf16.

    Done once outside the hot loop; the kernel consumes only the padded, fused
    tensors.  Biases stay f32 (they are added after the f32 accumulation).
    """
    w1, b1, w2, b2, wa, ba, wc, bc = params
    AP = _round_up(action_size, _LANE)
    # Fill the 256-wide MXU on v6e/v7x for non-tiny hidden sizes.
    HP = _round_up(hidden_size, 256) if hidden_size > _LANE else _LANE
    OP = _round_up(action_size + 1, _LANE)

    def pad2(a, rows, cols, dtype):
        out = jnp.zeros((rows, cols), dtype)
        return out.at[:a.shape[0], :a.shape[1]].set(a.astype(dtype))

    w1p = pad2(w1, AP, HP, jnp.bfloat16)
    b1p = pad2(b1, 1, HP, jnp.float32)
    w2p = pad2(w2, HP, HP, jnp.bfloat16)
    b2p = pad2(b2, 1, HP, jnp.float32)
    wh = jnp.concatenate([wa, wc], axis=1)           # [H, A+1] fused head
    bh = jnp.concatenate([ba, bc], axis=1)           # [1, A+1]
    whp = pad2(wh, HP, OP, jnp.bfloat16)
    bhp = pad2(bh, 1, OP, jnp.float32)
    return (w1p, b1p, w2p, b2p, whp, bhp)


def actor_critic_forward(state, padded_params, action_size):
    """state: [B, action_size] f32. Returns (action_probs [B, A], state_value [B, 1])."""
    w1p, b1p, w2p, b2p, whp, bhp = padded_params
    B, A = state.shape
    AP, HP = w1p.shape
    OP = whp.shape[1]

    # Batch tiling: big tiles amortize per-step overhead; >=2 grid steps when the
    # batch is large enough so the "parallel" axis can use v7x's second TC.
    if B >= 1024:
        TB = 512
    elif B > 256:
        TB = _round_up((B + 1) // 2, _SUBLANE)
    else:
        TB = _round_up(B, _SUBLANE)
    B_pad = _round_up(B, TB)
    grid = (B_pad // TB,)

    # Only the batch dim is padded; the feature dim stays at A (no 16x lane
    # inflation of the streamed activations in HBM).
    state_in = state.astype(jnp.float32)
    if B_pad != B:
        state_in = jnp.zeros((B_pad, A), jnp.float32).at[:B].set(state_in)

    # Weights/biases: constant block index -> VMEM-resident across grid steps.
    def resident(arr):
        return pl.BlockSpec(arr.shape, lambda i: (0,) * arr.ndim)

    weight_bytes = sum(int(a.size) * a.dtype.itemsize
                       for a in (w1p, b1p, w2p, b2p, whp, bhp))
    stream_bytes = 2 * TB * (A * 4 + OP * 4)      # double-buffered in/out tiles
    scratch_bytes = TB * AP * 4
    vmem_limit = min(2 * weight_bytes + stream_bytes + scratch_bytes + (24 << 20),
                     100 << 20)

    cost = pl.CostEstimate(
        flops=2 * B_pad * (AP * HP + HP * HP + HP * OP),
        transcendentals=B_pad * OP,
        bytes_accessed=int(state_in.size) * 4 + weight_bytes + B_pad * OP * 4,
    )

    out = pl.pallas_call(
        functools.partial(_actor_critic_kernel, action_size=action_size),
        out_shape=jax.ShapeDtypeStruct((B_pad, OP), jnp.float32),
        grid=grid,
        in_specs=[
            pl.BlockSpec((TB, A), lambda i: (i, 0)),   # streaming activations
            resident(w1p), resident(b1p),
            resident(w2p), resident(b2p),
            resident(whp), resident(bhp),
        ],
        out_specs=pl.BlockSpec((TB, OP), lambda i: (i, 0)),
        scratch_shapes=[pltpu.VMEM((TB, AP), jnp.float32)],   # lane-padded x tile
        compiler_params=pltpu.CompilerParams(
            dimension_semantics=("parallel",),
            vmem_limit_bytes=int(vmem_limit)),
        cost_estimate=cost,
    )(state_in, w1p, b1p, w2p, b2p, whp, bhp)

    probs = out[:B, :action_size]
    value = out[:B, action_size:action_size + 1]
    return probs, value


if __name__ == "__main__":
    hidden_size = 32
    action_size = 8

    key = jax.random.PRNGKey(0)
    k_params, k_state = jax.random.split(key)

    params = init_params(k_params, hidden_size, action_size)
    padded_params = prepare_params(params, hidden_size, action_size)

    def reference(state):
        w1, b1, w2, b2, wa, ba, wc, bc = params
        h1 = jnp.maximum(state @ w1 + b1, 0.0)
        h2 = jnp.maximum(h1 @ w2 + b2, 0.0)
        return jax.nn.softmax(h2 @ wa + ba, axis=-1), h2 @ wc + bc

    # batch=8: single-tile path; batch=300: batch padding + 2 parallel grid steps.
    for batch in (8, 300):
        ks = jax.random.fold_in(k_state, batch)
        state = jax.random.normal(ks, (batch, action_size), jnp.float32)

        probs, value = actor_critic_forward(state, padded_params, action_size)
        jax.block_until_ready((probs, value))

        ref_probs, ref_value = reference(state)
        assert probs.shape == (batch, action_size) and value.shape == (batch, 1)
        # bf16 MXU operands + approximate EUP reciprocal -> loosened tolerances.
        assert jnp.allclose(probs, ref_probs, atol=2e-2), "actor mismatch"
        assert jnp.allclose(value, ref_value, atol=5e-2), "critic mismatch"
        assert jnp.allclose(jnp.sum(probs, axis=-1), 1.0, atol=1e-2), \
            "probs not normalized"

    print("KERNEL_OK")
</pallas_src>

<mosaic_0001>
module attributes {stable_mosaic.version = 11 : i64} {
  func.func @_actor_critic_kernel(%arg0: i32, %arg1: memref<8x8xf32, #tpu.memory_space<vmem>>, %arg2: memref<128x128xbf16, #tpu.memory_space<vmem>>, %arg3: memref<1x128xf32, #tpu.memory_space<vmem>>, %arg4: memref<128x128xbf16, #tpu.memory_space<vmem>>, %arg5: memref<1x128xf32, #tpu.memory_space<vmem>>, %arg6: memref<128x128xbf16, #tpu.memory_space<vmem>>, %arg7: memref<1x128xf32, #tpu.memory_space<vmem>>, %arg8: memref<8x128xf32, #tpu.memory_space<vmem>>, %arg9: memref<8x128xf32, #tpu.memory_space<vmem>>) attributes {dimension_semantics = [#tpu.dimension_semantics<parallel>], iteration_bounds = array<i64: 1>, scalar_prefetch = 0 : i64, scratch_operands = 1 : i64, tpu.core_type = #tpu.core_type<tc>, window_params = [{transform_indices = @transform_0, window_bounds = array<i64: 8, 8>}, {pipeline_mode = #tpu.pipeline_mode<synchronous>, transform_indices = @transform_1, window_bounds = array<i64: 128, 128>}, {pipeline_mode = #tpu.pipeline_mode<synchronous>, transform_indices = @transform_2, window_bounds = array<i64: 1, 128>}, {pipeline_mode = #tpu.pipeline_mode<synchronous>, transform_indices = @transform_3, window_bounds = array<i64: 128, 128>}, {pipeline_mode = #tpu.pipeline_mode<synchronous>, transform_indices = @transform_4, window_bounds = array<i64: 1, 128>}, {pipeline_mode = #tpu.pipeline_mode<synchronous>, transform_indices = @transform_5, window_bounds = array<i64: 128, 128>}, {pipeline_mode = #tpu.pipeline_mode<synchronous>, transform_indices = @transform_6, window_bounds = array<i64: 1, 128>}, {transform_indices = @transform_7, window_bounds = array<i64: 8, 128>}]} {
    %c0 = arith.constant 0 : index
    %c0_0 = arith.constant 0 : index
    %0 = vector.load %arg1[%c0, %c0_0] : memref<8x8xf32, #tpu.memory_space<vmem>>, vector<8x8xf32>
    %c0_1 = arith.constant 0 : index
    %c0_2 = arith.constant 0 : index
    %1 = vector.load %arg9[%c0_1, %c0_2] : memref<8x128xf32, #tpu.memory_space<vmem>>, vector<8x8xf32>
    tpu.vector_store %arg9[%c0_1, %c0_2], %0 {strides = array<i32>} : memref<8x128xf32, #tpu.memory_space<vmem>>, vector<8x8xf32>,
    %cst = arith.constant 0.000000e+00 : f32
    %2 = vector.broadcast %cst : f32 to vector<8x120xf32>
    %c0_3 = arith.constant 0 : index
    %c8 = arith.constant 8 : index
    %3 = vector.load %arg9[%c0_3, %c8] : memref<8x128xf32, #tpu.memory_space<vmem>>, vector<8x120xf32>
    tpu.vector_store %arg9[%c0_3, %c8], %2 {strides = array<i32>} : memref<8x128xf32, #tpu.memory_space<vmem>>, vector<8x120xf32>,
    %c0_4 = arith.constant 0 : index
    %c0_5 = arith.constant 0 : index
    %4 = vector.load %arg9[%c0_4, %c0_5] : memref<8x128xf32, #tpu.memory_space<vmem>>, vector<8x128xf32>
    %5 = arith.truncf %4 : vector<8x128xf32> to vector<8x128xbf16>
    %c0_6 = arith.constant 0 : index
    %c0_7 = arith.constant 0 : index
    %6 = vector.load %arg2[%c0_6, %c0_7] : memref<128x128xbf16, #tpu.memory_space<vmem>>, vector<128x128xbf16>
    %cst_8 = arith.constant dense<0.000000e+00> : vector<8x128xf32>
    %7 = tpu.matmul %5, %6, %cst_8 {dimension_numbers = #tpu.dot_dimension_numbers<[1], [0], [0], [1], [0, 0, 1, 1], [], []>} : vector<8x128xbf16>, vector<128x128xbf16>, vector<8x128xf32> -> vector<8x128xf32>
    %c0_9 = arith.constant 0 : index
    %c0_10 = arith.constant 0 : index
    %8 = vector.load %arg3[%c0_9, %c0_10] : memref<1x128xf32, #tpu.memory_space<vmem>>, vector<1x128xf32>
    %9 = vector.broadcast %8 : vector<1x128xf32> to vector<8x128xf32>
    %10 = arith.addf %7, %9 : vector<8x128xf32>
    %cst_11 = arith.constant 0.000000e+00 : f32
    %11 = vector.broadcast %cst_11 : f32 to vector<8x128xf32>
    %12 = arith.maximumf %10, %11 : vector<8x128xf32>
    %13 = arith.truncf %12 : vector<8x128xf32> to vector<8x128xbf16>
    %c0_12 = arith.constant 0 : index
    %c0_13 = arith.constant 0 : index
    %14 = vector.load %arg4[%c0_12, %c0_13] : memref<128x128xbf16, #tpu.memory_space<vmem>>, vector<128x128xbf16>
    %cst_14 = arith.constant dense<0.000000e+00> : vector<8x128xf32>
    %15 = tpu.matmul %13, %14, %cst_14 {dimension_numbers = #tpu.dot_dimension_numbers<[1], [0], [0], [1], [0, 0, 1, 1], [], []>} : vector<8x128xbf16>, vector<128x128xbf16>, vector<8x128xf32> -> vector<8x128xf32>
    %c0_15 = arith.constant 0 : index
    %c0_16 = arith.constant 0 : index
    %16 = vector.load %arg5[%c0_15, %c0_16] : memref<1x128xf32, #tpu.memory_space<vmem>>, vector<1x128xf32>
    %17 = vector.broadcast %16 : vector<1x128xf32> to vector<8x128xf32>
    %18 = arith.addf %15, %17 : vector<8x128xf32>
    %cst_17 = arith.constant 0.000000e+00 : f32
    %19 = vector.broadcast %cst_17 : f32 to vector<8x128xf32>
    %20 = arith.maximumf %18, %19 : vector<8x128xf32>
    %21 = arith.truncf %20 : vector<8x128xf32> to vector<8x128xbf16>
    %c0_18 = arith.constant 0 : index
    %c0_19 = arith.constant 0 : index
    %22 = vector.load %arg6[%c0_18, %c0_19] : memref<128x128xbf16, #tpu.memory_space<vmem>>, vector<128x128xbf16>
    %cst_20 = arith.constant dense<0.000000e+00> : vector<8x128xf32>
    %23 = tpu.matmul %21, %22, %cst_20 {dimension_numbers = #tpu.dot_dimension_numbers<[1], [0], [0], [1], [0, 0, 1, 1], [], []>} : vector<8x128xbf16>, vector<128x128xbf16>, vector<8x128xf32> -> vector<8x128xf32>
    %c0_21 = arith.constant 0 : index
    %c0_22 = arith.constant 0 : index
    %24 = vector.load %arg7[%c0_21, %c0_22] : memref<1x128xf32, #tpu.memory_space<vmem>>, vector<1x128xf32>
    %25 = vector.broadcast %24 : vector<1x128xf32> to vector<8x128xf32>
    %26 = arith.addf %23, %25 : vector<8x128xf32>
    %27 = tpu.iota {dimensions = array<i32: 1>} : vector<8x128xi32>
    %c8_i32 = arith.constant 8 : i32
    %28 = vector.broadcast %c8_i32 : i32 to vector<8x128xi32>
    %29 = arith.cmpi slt, %27, %28 : vector<8x128xi32>
    %cst_23 = arith.constant -1.000000e+30 : f32
    %30 = vector.broadcast %cst_23 : f32 to vector<8x128xf32>
    %31 = arith.select %29, %26, %30 : vector<8x128xi1>, vector<8x128xf32>
    %cst_24 = arith.constant dense<0xFF800000> : vector<8xf32>
    %32 = vector.multi_reduction <maximumf>, %31, %cst_24 [1] : vector<8x128xf32> to vector<8xf32>
    %33 = vector.shape_cast %32 : vector<8xf32> to vector<8x1xf32>
    %34 = vector.broadcast %33 : vector<8x1xf32> to vector<8x128xf32>
    %35 = arith.subf %31, %34 : vector<8x128xf32>
    %36 = math.exp %35 : vector<8x128xf32>
    %cst_25 = arith.constant dense<0.000000e+00> : vector<8xf32>
    %37 = vector.multi_reduction <add>, %36, %cst_25 [1] : vector<8x128xf32> to vector<8xf32>
    %38 = vector.shape_cast %37 : vector<8xf32> to vector<8x1xf32>
    %39 = tpu.reciprocal %38 {approx = true} : vector<8x1xf32> -> vector<8x1xf32>
    %40 = vector.broadcast %39 : vector<8x1xf32> to vector<8x128xf32>
    %41 = arith.mulf %36, %40 : vector<8x128xf32>
    %42 = arith.select %29, %41, %26 : vector<8x128xi1>, vector<8x128xf32>
    %c0_26 = arith.constant 0 : index
    %c0_27 = arith.constant 0 : index
    %43 = vector.load %arg8[%c0_26, %c0_27] : memref<8x128xf32, #tpu.memory_space<vmem>>, vector<8x128xf32>
    tpu.vector_store %arg8[%c0_26, %c0_27], %42 {strides = array<i32>} : memref<8x128xf32, #tpu.memory_space<vmem>>, vector<8x128xf32>,
    return
  }
  func.func @transform_0(%arg0: i32) -> (i32, i32) {
    %c0_i32 = arith.constant 0 : i32
    %c0_i32_0 = arith.constant 0 : i32
    return %arg0, %c0_i32 : i32, i32
  }
  func.func @transform_1(%arg0: i32) -> (i32, i32) {
    %c0_i32 = arith.constant 0 : i32
    %c0_i32_0 = arith.constant 0 : i32
    %c0_i32_1 = arith.constant 0 : i32
    return %c0_i32, %c0_i32_0 : i32, i32
  }
  func.func @transform_2(%arg0: i32) -> (i32, i32) {
    %c0_i32 = arith.constant 0 : i32
    %c0_i32_0 = arith.constant 0 : i32
    %c0_i32_1 = arith.constant 0 : i32
    return %c0_i32, %c0_i32_0 : i32, i32
  }
  func.func @transform_3(%arg0: i32) -> (i32, i32) {
    %c0_i32 = arith.constant 0 : i32
    %c0_i32_0 = arith.constant 0 : i32
    %c0_i32_1 = arith.constant 0 : i32
    return %c0_i32, %c0_i32_0 : i32, i32
  }
  func.func @transform_4(%arg0: i32) -> (i32, i32) {
    %c0_i32 = arith.constant 0 : i32
    %c0_i32_0 = arith.constant 0 : i32
    %c0_i32_1 = arith.constant 0 : i32
    return %c0_i32, %c0_i32_0 : i32, i32
  }
  func.func @transform_5(%arg0: i32) -> (i32, i32) {
    %c0_i32 = arith.constant 0 : i32
    %c0_i32_0 = arith.constant 0 : i32
    %c0_i32_1 = arith.constant 0 : i32
    return %c0_i32, %c0_i32_0 : i32, i32
  }
  func.func @transform_6(%arg0: i32) -> (i32, i32) {
    %c0_i32 = arith.constant 0 : i32
    %c0_i32_0 = arith.constant 0 : i32
    %c0_i32_1 = arith.constant 0 : i32
    return %c0_i32, %c0_i32_0 : i32, i32
  }
  func.func @transform_7(%arg0: i32) -> (i32, i32) {
    %c0_i32 = arith.constant 0 : i32
    %c0_i32_0 = arith.constant 0 : i32
    return %arg0, %c0_i32 : i32, i32
  }
}

</mosaic_0001>

<bundles_post_ra>
// kernel: tpu_custom_call.1
= control target key start
LH: loop header
LB: loop body
LE: loop exit
PB: predicated region body
PF: predicated region fallthrough
CT: control target
= control target key end

     0   :  { %12 = vsyncpa [#allocation4], 0  ;;  %s886_s0 = inlined_call_operand.hbm [shape: f32[8,8], index: 0, kind: input, shape index: {}]   ;;  %s887_s1 = inlined_call_operand.hbm [shape: bf16[128,128], index: 1, kind: input, shape index: {}]   ;;  %s888_s2 = inlined_call_operand.vmem [shape: f32[1,128], index: 2, kind: input, shape index: {}]   ;;  %s889_s3 = inlined_call_operand.hbm [shape: bf16[128,128], index: 3, kind: input, shape index: {}]   ;;  %s890_s4 = inlined_call_operand.vmem [shape: f32[1,128], index: 4, kind: input, shape index: {}]   ;;  %s891_s5 = inlined_call_operand.hbm [shape: bf16[128,128], index: 5, kind: input, shape index: {}]   ;;  %s892_s6 = inlined_call_operand.vmem [shape: f32[1,128], index: 6, kind: input, shape index: {}]   ;;  %s893_s7 = inlined_call_operand.hbm [shape: f32[8,128], index: 7, kind: output, shape index: {}]  }
   0x1   :  { %13 = vsyncpa [#allocation7], 0 }
   0x2   :  { %14 = vsyncpa [#allocation10], 0 }
   0x3   :  { %15 = vsyncpa [#allocation5], 0  ;;  %s726_s24 = smov [#allocation6]   ;;  %s608_s28 = scalar_lea.hbm %s887_s1, 1024 }
   0x4   :  { %s31_s25 = sshll.u32 %s726_s24, 4  ;;  %p609_p0 = scmp.ne.s32.totalorder %s887_s1, %s608_s28  ;;  %s32_s25 = int_to_ptr.vmem [resolvable:$true] %s31_s25 }
   0x5   :  { %p612_p1 = scmp.lt.u32.totalorder %s608_s28, %s887_s1 }
   0x7   :  { %p614_p2 = pnand %p612_p1, %p609_p0 }
   0x9   :  { %617 = shalt.err (!%p614_p2)
}
   0xa   :  { %s618_s10 = scalar_lea.vmem %s32_s25, 1024  ;;  %p623_p4 = scmp.lt.s32.totalorder %s32_s25, %s32_s25 }
   0xb   :  { %p619_p3 = scmp.ne.s32.totalorder %s32_s25, %s618_s10  ;;  %p624_p5 = scmp.lt.s32.totalorder %s618_s10, %s618_s10 }
   0xd   :  { %p625_p6 = por %p624_p5, %p623_p4 }
   0xf   :  { %p626_p7 = pnand %p625_p6, %p619_p3 }
  0x11   :  { %629 = shalt.err (!%p626_p7)
}
  0x12   :  { %s727_s11 = smov 64   ;;  %s728_s12 = smov 4  }
  0x13   :  { %37 = dma.hbm_to_vmem [thread:$0]  %s887_s1, 1024, %s32_s25, [#allocation7], %s727_s11, %s727_s11, %s728_s12  }
  0x14   :  { %s729_s15 = smov [#allocation3]   ;;  %s730_s17 = smov [#allocation8]  }
  0x15   :  { %s22_s16 = sshll.u32 %s729_s15, 4  ;;  %s45_s18 = sshll.u32 %s730_s17, 4  ;;  %s23_s16 = int_to_ptr.vmem [resolvable:$true] %s22_s16  ;;  %s46_s18 = int_to_ptr.vmem [resolvable:$true] %s45_s18 }
  0x16   :  { %s630_s21 = scalar_lea.hbm %s886_s0, 128 }
  0x17   :  { %p631_p8 = scmp.ne.s32.totalorder %s886_s0, %s630_s21  ;;  %p634_p9 = scmp.lt.u32.totalorder %s630_s21, %s886_s0 }
  0x19   :  { %p636_p10 = pnand %p634_p9, %p631_p8 }
  0x1b   :  { %639 = shalt.err (!%p636_p10)
}
  0x1c   :  { %s640_s1 = scalar_lea.vmem %s23_s16, 128  ;;  %p645_p12 = scmp.lt.s32.totalorder %s23_s16, %s23_s16 }
  0x1d   :  { %p641_p11 = scmp.ne.s32.totalorder %s23_s16, %s640_s1  ;;  %p646_p13 = scmp.lt.s32.totalorder %s640_s1, %s640_s1 }
  0x1f   :  { %p647_p0 = por %p646_p13, %p645_p12 }
  0x21   :  { %p648_p1 = pnand %p647_p0, %p641_p11 }
  0x23   :  { %651 = shalt.err (!%p648_p1)
}
  0x24   :  { %25 = dma.hbm_to_vmem [thread:$0]  %s886_s0, 128, %s23_s16, [#allocation4]  }
  0x25   :  { %s652_s30 = scalar_lea.hbm %s889_s3, 1024 }
  0x26   :  { %p653_p2 = scmp.ne.s32.totalorder %s889_s3, %s652_s30  ;;  %p656_p3 = scmp.lt.u32.totalorder %s652_s30, %s889_s3 }
  0x28   :  { %p658_p4 = pnand %p656_p3, %p653_p2 }
  0x2a   :  { %661 = shalt.err (!%p658_p4)
}
  0x2b   :  { %s662_s14 = scalar_lea.vmem %s46_s18, 1024  ;;  %p667_p6 = scmp.lt.s32.totalorder %s46_s18, %s46_s18 }
  0x2c   :  { %p663_p5 = scmp.ne.s32.totalorder %s46_s18, %s662_s14  ;;  %p668_p7 = scmp.lt.s32.totalorder %s662_s14, %s662_s14 }
  0x2e   :  { %p669_p8 = por %p668_p7, %p667_p6 }
  0x30   :  { %p670_p9 = pnand %p669_p8, %p663_p5 }
  0x32   :  { %673 = shalt.err (!%p670_p9)
}
  0x33   :  { %51 = dma.hbm_to_vmem [thread:$0]  %s889_s3, 1024, %s46_s18, [#allocation7], %s727_s11, %s727_s11, %s728_s12  }
  0x34   :  { %s731_s16 = smov [#allocation9]   ;;  %s674_s21 = scalar_lea.hbm %s891_s5, 1024 }
  0x35   :  { %s59_s17 = sshll.u32 %s731_s16, 4  ;;  %p675_p10 = scmp.ne.s32.totalorder %s891_s5, %s674_s21  ;;  %s60_s17 = int_to_ptr.vmem [resolvable:$true] %s59_s17 }
  0x36   :  { %p678_p11 = scmp.lt.u32.totalorder %s674_s21, %s891_s5 }
  0x38   :  { %p680_p12 = pnand %p678_p11, %p675_p10 }
  0x3a   :  { %683 = shalt.err (!%p680_p12)
}
  0x3b   :  { %s684_s1 = scalar_lea.vmem %s60_s17, 1024  ;;  %p689_p0 = scmp.lt.s32.totalorder %s60_s17, %s60_s17 }
  0x3c   :  { %p685_p13 = scmp.ne.s32.totalorder %s60_s17, %s684_s1  ;;  %p690_p1 = scmp.lt.s32.totalorder %s684_s1, %s684_s1 }
  0x3e   :  { %p691_p2 = por %p690_p1, %p689_p0 }
  0x40   :  { %p692_p3 = pnand %p691_p2, %p685_p13 }
  0x42   :  { %695 = shalt.err (!%p692_p3)
}
  0x43   :  { %65 = dma.hbm_to_vmem [thread:$0]  %s891_s5, 1024, %s60_s17, [#allocation10], %s727_s11, %s727_s11, %s728_s12  }
  0x44   :  { %718 = dma.done.wait [#allocation4], 128  }
  0x45   :  { %719 = vsyncadd [#allocation4], 4294967168 }
  0x46   :  { %720 = dma.done.wait [#allocation7], 2048  }
  0x47   :  { %721 = vsyncadd [#allocation7], 4294965248 }
  0x48   :  { %722 = dma.done.wait [#allocation10], 1024  }
  0x49   :  { %723 = vsyncadd [#allocation10], 4294966272  ;;  %v732_v0 = vmov 0.0   ;;  %vm733_vm0 = vmmov 0   ;;  %v580_v1 = vld [vmem:[#allocation6] sm:$0xff]   ;;  %v581_v2 = vld [vmem:[#allocation6 + $0x8] sm:$0xff]   ;;  %v425_v44 = vlaneseq }
  0x4a   :  { %511 = vmatprep.subr.bf16.mxu0 %v732_v0  ;;  %527 = vmatprep.mubr.msk.bf16.mxu0 %vm733_vm0, %v732_v0  ;;  %v582_v3 = vld [vmem:[#allocation6 + $0x10] sm:$0xff]   ;;  %vm82_vm1 = vcmask 64512   ;;  %vm84_vm2 = vcmask 1047616   ;;  %v81_v4 = vld [vmem:[#allocation3] sm:$0xff]  ;;  %v588_v5 = vld [vmem:[#allocation8] sm:$0xff]  }
  0x4b   :  { %531 = vmatprep.subr.bf16.mxu1 %v732_v0  ;;  %547 = vmatprep.mubr.msk.bf16.mxu1 %vm733_vm0, %v732_v0  ;;  %83 = vst.msk [vmem:[#allocation2] sm:$0xff] %vm82_vm1, %v81_v4  ;;  %v583_v6 = vld [vmem:[#allocation6 + $0x18] sm:$0xff]   ;;  %v589_v7 = vld [vmem:[#allocation8 + $0x8] sm:$0xff]   ;;  %v584_v8 = vld [vmem:[#allocation6 + $0x20] sm:$0xff]   ;;  %v426_v45 = vand.u32 127, %v425_v44 }
  0x4c   :  { %512 = vmatpush3.bf16.msra.mxu0 %v580_v1  ;;  %85 = vst.msk [vmem:[#allocation2] sm:$0xff] %vm84_vm2, %v732_v0  ;;  %532 = vmatpush3.bf16.msra.mxu1 %v588_v5  ;;  %v590_v9 = vld [vmem:[#allocation8 + $0x10] sm:$0xff]   ;;  %v585_v10 = vld [vmem:[#allocation6 + $0x28] sm:$0xff]   ;;  %v591_v11 = vld [vmem:[#allocation8 + $0x18] sm:$0xff]  }
  0x4d   :  { %513 = vmatprep.subr.bf16.mxu0 %v732_v0  ;;  %533 = vmatprep.subr.bf16.mxu1 %v732_v0  ;;  %v586_v12 = vld [vmem:[#allocation6 + $0x30] sm:$0xff]   ;;  %v592_v13 = vld [vmem:[#allocation8 + $0x20] sm:$0xff]   ;;  %v587_v14 = vld [vmem:[#allocation6 + $0x38] sm:$0xff]   ;;  %vm427_vm3 = vcmp.lt.s32.totalorder %v426_v45, 8 }
  0x4e   :  { %v593_v16 = vld [vmem:[#allocation8 + $0x28] sm:$0xff]   ;;  %v594_v18 = vld [vmem:[#allocation8 + $0x30] sm:$0xff]   ;;  %v595_v19 = vld [vmem:[#allocation8 + $0x38] sm:$0xff]  }
  0x4f   :  { %v596_v20 = vld [vmem:[#allocation9] sm:$0xff]   ;;  %v597_v21 = vld [vmem:[#allocation9 + $0x8] sm:$0xff]   ;;  %v598_v22 = vld [vmem:[#allocation9 + $0x10] sm:$0xff]  }
  0x50   :  { %514 = vmatpush3.bf16.msra.mxu0 %v581_v2  ;;  %534 = vmatpush3.bf16.msra.mxu1 %v589_v7  ;;  %v599_v23 = vld [vmem:[#allocation9 + $0x18] sm:$0xff]   ;;  %v600_v24 = vld [vmem:[#allocation9 + $0x20] sm:$0xff]   ;;  %v601_v25 = vld [vmem:[#allocation9 + $0x28] sm:$0xff]  }
  0x51   :  { %515 = vmatprep.subr.bf16.mxu0 %v732_v0  ;;  %535 = vmatprep.subr.bf16.mxu1 %v732_v0  ;;  %v457_v26 = vld [vmem:[%s888_s2] ss:$0 sm:$0xff]  ;;  %v603_v35 = vld [vmem:[#allocation9 + $0x38] sm:$0xff]  }
  0x52   :  { %v602_v34 = vld [vmem:[#allocation9 + $0x30] sm:$0xff]  }
  0x53   :  { %v86_v15 = vld [vmem:[#allocation2] sm:$0xff] }
  0x54   :  { %516 = vmatpush3.bf16.msra.mxu0 %v582_v3  ;;  %536 = vmatpush3.bf16.msra.mxu1 %v590_v9  ;;  %v87_v17 = vpack.c.bf16 %v86_v15, %v86_v15  ;;  %v466_v36 = vld [vmem:[%s890_s4] ss:$0 sm:$0xff]  ;;  %s734_s4 = smov [#allocation11]  }
  0x55   :  { %517 = vmatprep.subr.bf16.mxu0 %v732_v0  ;;  %537 = vmatprep.subr.bf16.mxu1 %v732_v0  ;;  %v475_v46 = vld [vmem:[%s892_s6] ss:$0 sm:$0xff]  ;;  %s446_s28 = sshll.u32 %s734_s4, 4  ;;  %s447_s28 = int_to_ptr.vmem [resolvable:$true] %s446_s28 }
  0x56   :  { %s696_s6 = scalar_lea.vmem %s447_s28, 128  ;;  %p701_p5 = scmp.lt.s32.totalorder %s447_s28, %s447_s28 }
  0x57   :  { %p697_p4 = scmp.ne.s32.totalorder %s447_s28, %s696_s6  ;;  %p702_p6 = scmp.lt.s32.totalorder %s696_s6, %s696_s6 }
  0x58   :  { %518 = vmatpush3.bf16.msra.mxu0 %v583_v6  ;;  %538 = vmatpush3.bf16.msra.mxu1 %v591_v11 }
  0x59   :  { %519 = vmatprep.subr.bf16.mxu0 %v732_v0  ;;  %539 = vmatprep.subr.bf16.mxu1 %v732_v0  ;;  %p703_p7 = por %p702_p6, %p701_p5 }
  0x5b   :  { %p704_p8 = pnand %p703_p7, %p697_p4 }
  0x5c   :  { %520 = vmatpush3.bf16.msra.mxu0 %v584_v8  ;;  %540 = vmatpush3.bf16.msra.mxu1 %v592_v13 }
  0x5d   :  { %521 = vmatprep.subr.bf16.mxu0 %v732_v0  ;;  %541 = vmatprep.subr.bf16.mxu1 %v732_v0 }
  0x60   :  { %522 = vmatpush3.bf16.msra.mxu0 %v585_v10  ;;  %542 = vmatpush3.bf16.msra.mxu1 %v593_v16 }
  0x61   :  { %523 = vmatprep.subr.bf16.mxu0 %v732_v0  ;;  %543 = vmatprep.subr.bf16.mxu1 %v732_v0 }
  0x64   :  { %524 = vmatpush3.bf16.msra.mxu0 %v586_v12  ;;  %544 = vmatpush3.bf16.msra.mxu1 %v594_v18 }
  0x65   :  { %525 = vmatprep.subr.bf16.mxu0 %v732_v0  ;;  %545 = vmatprep.subr.bf16.mxu1 %v732_v0 }
  0x68   :  { %526 = vmatpush3.bf16.msra.mxu0 %v587_v14  ;;  %546 = vmatpush3.bf16.msra.mxu1 %v595_v19 }
  0x69   :  { %551 = vmatprep.subr.bf16.mxu0 %v732_v0 }
  0x6b   :  { %528 = vmatmul.mubr.bf16.vlgmr.msra.gmra.mrb[0].mxu0 %v87_v17 }
  0x6c   :  { %567 = vmatprep.mubr.msk.bf16.mxu0 %vm733_vm0, %v732_v0  ;;  %552 = vmatpush3.bf16.msra.mxu0 %v596_v20 }
  0x6d   :  { %553 = vmatprep.subr.bf16.mxu0 %v732_v0 }
  0x70   :  { %554 = vmatpush3.bf16.msra.mxu0 %v597_v21 }
  0x71   :  { %555 = vmatprep.subr.bf16.mxu0 %v732_v0 }
  0x74   :  { %556 = vmatpush3.bf16.msra.mxu0 %v598_v22 }
  0x75   :  { %557 = vmatprep.subr.bf16.mxu0 %v732_v0 }
  0x78   :  { %558 = vmatpush3.bf16.msra.mxu0 %v599_v23 }
  0x79   :  { %559 = vmatprep.subr.bf16.mxu0 %v732_v0 }
  0x7c   :  { %560 = vmatpush3.bf16.msra.mxu0 %v600_v24 }
  0x7d   :  { %561 = vmatprep.subr.bf16.mxu0 %v732_v0 }
  0x80   :  { %562 = vmatpush3.bf16.msra.mxu0 %v601_v25 }
  0x81   :  { %563 = vmatprep.subr.bf16.mxu0 %v732_v0 }
  0x84   :  { %564 = vmatpush3.bf16.msra.mxu0 %v602_v34 }
  0x85   :  { %565 = vmatprep.subr.bf16.mxu0 %v732_v0 }
  0x88   :  { %566 = vmatpush3.bf16.msra.mxu0 %v603_v35 }
 0x13e   :  { %v193_v27 = vpop.f32.mrb[0].mxu0 }
 0x13f   :  { %v194_v28 = vadd.f32 %v457_v26, %v193_v27  ;;  %v529_v29 = vpop.f32.mrb[1].mxu0 }
 0x140   :  { %v196_v30 = vpop.f32.mrb[2].mxu0 }
 0x141   :  { %v199_v31 = vmax.f32 %v194_v28, 0.0  ;;  %v530_v32 = vpop.f32.mrb[3].mxu0 }
 0x143   :  { %v200_v33 = vpack.c.bf16 %v199_v31, %v199_v31 }
 0x145   :  { %548 = vmatmul.mubr.bf16.vlgmr.msra.gmra.mrb[0].mxu1 %v200_v33 }
 0x218   :  { %v306_v37 = vpop.f32.mrb[0].mxu1 }
 0x219   :  { %v307_v38 = vadd.f32 %v466_v36, %v306_v37  ;;  %v549_v39 = vpop.f32.mrb[1].mxu1 }
 0x21a   :  { %v309_v40 = vpop.f32.mrb[2].mxu1 }
 0x21b   :  { %v312_v41 = vmax.f32 %v307_v38, 0.0  ;;  %v550_v42 = vpop.f32.mrb[3].mxu1 }
 0x21d   :  { %v313_v43 = vpack.c.bf16 %v312_v41, %v312_v41 }
 0x21f   :  { %568 = vmatmul.mubr.bf16.vlgmr.msra.gmra.mrb[4].mxu0 %v313_v43 }
 0x2f2   :  { %v419_v47 = vpop.f32.mrb[4].mxu0 }
 0x2f3   :  { %v420_v48 = vadd.f32 %v475_v46, %v419_v47  ;;  %v569_v49 = vpop.f32.mrb[5].mxu0 }
 0x2f4   :  { %v422_v50 = vpop.f32.mrb[6].mxu0 }
 0x2f5   :  { %v570_v51 = vpop.f32.mrb[7].mxu0  ;;  %v428_v52 = vsel %vm427_vm3, %v420_v48, -1e+30 }
 0x2f6   :  { %429 = vmax.xlane.f32.xlu0 %v428_v52 }
 0x383   :  { %v430_v53 = vpop.xlane.xlu0 %429 }
 0x384   :  { %v431_v54 = vsub.f32 %v428_v52, %v430_v53 }
 0x386   :  { %v432_v55 = vmul.f32 1.442695, %v431_v54 }
 0x388   :  { %604 = vpow2.f32 %v432_v55 }
 0x392   :  { %v605_v56 = vpop.eup %604 }
 0x393   :  { %434 = vadd.xlane.f32.xlu0 %v605_v56 }
 0x420   :  { %v435_v57 = vpop.xlane.xlu0 %434 }
 0x421   :  { %606 = vrcp.f32 %v435_v57 }
 0x42b   :  { %v607_v58 = vpop.eup %606 }
 0x42c   :  { %v437_v59 = vmul.f32 %v607_v58, %v605_v56 }
 0x42e   :  { %v438_v60 = vsel %vm427_vm3, %v437_v59, %v420_v48 }
 0x42f   :  { %439 = vst [vmem:[#allocation11] sm:$0xff] %v438_v60 }
 0x430   :  { %707 = shalt.err (!%p704_p8)
}
 0x431   :  { %s708_s8 = scalar_lea.hbm %s893_s7, 128 }
 0x432   :  { %p709_p9 = scmp.ne.s32.totalorder %s893_s7, %s708_s8  ;;  %p712_p10 = scmp.lt.u32.totalorder %s708_s8, %s893_s7 }
 0x434   :  { %p714_p11 = pnand %p712_p10, %p709_p9 }
 0x436   :  { %717 = shalt.err (!%p714_p11)
}
 0x437   :  { %449 = dma.vmem_to_hbm [thread:$0]  %s447_s28, 128, %s893_s7, [#allocation5]  }
 0x438   :  { %724 = dma.done.wait [#allocation5], 128  }
 0x439   :  { %725 = vsyncadd [#allocation5], 4294967168 }
 0x43a   :  { %453 = vsyncpa [#allocation4], 1 }
 0x43b   :  { %454 = vsyncpa [#allocation7], 1 }
 0x43c   :  { %455 = vsyncpa [#allocation10], 1 }
 0x43d   :  { %456 = vsyncpa [#allocation5], 1 }

</bundles_post_ra>
